<compile_context>
chip_gen: v6e
topology: v6e:2x2x1
jax: 0.10.0
libtpu: 0.0.40
codegen_flags: <defaults>
</compile_context>

<pallas_src>
import functools

import jax
import jax.numpy as jnp
from jax.experimental import pallas as pl
from jax.experimental.pallas import tpu as pltpu

_LANE = 128
_TARGET_BLOCK_BYTES = 512 * 1024        # per-block buffer target
_ROW_FALLBACK_BYTES = 6 * 1024 * 1024   # cap for the W % 128 != 0 whole-row path


def _log_trend_kernel(rows_ref, gains_ref, starts_ref, lens_ref, x_ref, o_ref,
                      *, w_axis, seg):
    """One grid step updates one (1, segs, seg) chunk of one selected row."""
    c = pl.program_id(1 - w_axis)        # which selected row (event index)
    j = pl.program_id(w_axis)            # which chunk of that row
    segs = x_ref.shape[1]                # segments in this block (static)

    gain = gains_ref[c]                  # f32 scalar (SMEM)
    start = starts_ref[c]                # i32 scalar
    length = lens_ref[c]                 # i32 scalar

    # Global time index of element (0, s, l) of this block:
    #   col = (j*segs + s) * seg + l ;  off = col - start
    shift = j * (segs * seg) - start                                   # scalar
    s_iota = jax.lax.broadcasted_iota(jnp.int32, x_ref.shape, 1)
    l_iota = jax.lax.broadcasted_iota(jnp.int32, x_ref.shape, 2)
    off = s_iota * seg + l_iota + shift

    # Single unsigned compare covers 0 <= off < length (negative off wraps big).
    inside = off.astype(jnp.uint32) < length.astype(jnp.uint32)

    # Off-event lanes are clamped to 1 so log(1) = 0 and (finite) gain * 0 = 0:
    # no outer select needed.  off == 0 inside the event intentionally gives
    # log(0) = -inf, matching torch.log(torch.arange(0, L)) verbatim.
    trend = gain * jnp.log(jnp.where(inside, off, 1).astype(jnp.float32))
    o_ref[...] = (x_ref[...].astype(jnp.float32) + trend).astype(o_ref.dtype)


def _auto_block_segs(n_seg, seg, itemsize, C):
    """Segments per block: ~512 KiB buffers, even total step count for v7x."""
    target = max(8, ((_TARGET_BLOCK_BYTES // (seg * itemsize)) // 8) * 8)
    if n_seg <= target:
        return n_seg
    bs = target
    n_w = pl.cdiv(n_seg, bs)
    if n_w > 1 and (n_w * max(C, 1)) % 2 == 1:
        # Even total -> both v7x TensorCores get equal work (extra step is
        # noise on single-TC v5e/v6e).
        n_w += 1
        bs = min(n_seg, max(8, ((pl.cdiv(n_seg, n_w) + 7) // 8) * 8))
    return bs


def _xla_fallback(x, rows, gains, starts, lens):
    """Pure-JAX forward (tiny-problem fast path and numerical reference)."""
    W = x.shape[1]
    col = jnp.arange(W, dtype=jnp.int32)[None, :]
    off = col - starts[:, None].astype(jnp.int32)
    inside = (off >= 0) & (off < lens[:, None].astype(jnp.int32))
    trend = gains[:, None].astype(jnp.float32) * jnp.log(
        jnp.where(inside, off, 1).astype(jnp.float32))
    upd = x[rows].astype(jnp.float32) + jnp.where(inside, trend, 0.0)
    return x.at[rows].set(upd.astype(x.dtype))


_reference = _xla_fallback


def logarithmic_trend(x, rows, gains, starts, lens, *,
                      block_samples=None, min_pallas_bytes=0):
    """Apply x[r, s:s+L] += g * log(arange(0, L)) for each selected row r.

    x:    (H, W) 2-D signal (as the torch module's forward expects).
    rows: (C,) distinct row indices (from a permutation).  Duplicates would
          race on the aliased output -- keep them distinct.
    For a zero-copy in-place update, donate x at the jit boundary.
    """
    H, W = x.shape
    C = int(rows.shape[0])
    if C == 0:
        return x
    itemsize = x.dtype.itemsize

    rows = rows.astype(jnp.int32)
    gains = gains.astype(jnp.float32)
    starts = starts.astype(jnp.int32)
    lens = lens.astype(jnp.int32)

    # Tiny problems: fixed pallas_call dispatch exceeds the work; let XLA fuse.
    # (Disabled by default so the demo always exercises the kernel.)
    if 2 * C * W * itemsize < min_pallas_bytes:
        return _xla_fallback(x, rows, gains, starts, lens)

    # View the time axis as (n_seg, seg): blocks become sublane-dense (8,128)
    # slabs of a single row; the reshape is a bitcast.
    if W % _LANE == 0:
        seg = _LANE
    else:
        seg = W                      # whole row is one (1-sublane) segment
        if W * itemsize > _ROW_FALLBACK_BYTES:
            # TODO(synk): add a padded-copy path for huge rows whose width is
            # not a multiple of 128; fall back to XLA there for now.
            return _xla_fallback(x, rows, gains, starts, lens)
    n_seg = W // seg

    if block_samples is None:
        bs = _auto_block_segs(n_seg, seg, itemsize, C)
    else:
        # Round user overrides to a legal block: multiple of 8 segments or the
        # full segment axis (keeps the (8,128) BlockSpec rule satisfied).
        bs = max(1, int(block_samples) // seg)
        bs = n_seg if bs >= n_seg else min(n_seg, max(8, (bs // 8) * 8))
    n_w = pl.cdiv(n_seg, bs)

    # Bigger parallel axis first so megacore sharding (v7x) sees it.
    if n_w >= C:
        grid = (n_w, C)
        w_axis = 0
        x_map = lambda j, c, rows_r, g_r, s_r, l_r: (rows_r[c], j, 0)
    else:
        grid = (C, n_w)
        w_axis = 1
        x_map = lambda c, j, rows_r, g_r, s_r, l_r: (rows_r[c], j, 0)

    x_view = x.reshape(H, n_seg, seg)
    x_spec = pl.BlockSpec((1, bs, seg), x_map)

    block_bytes = bs * seg * itemsize
    vmem_limit = int(min(48 << 20, max(16 << 20, 16 * block_bytes)))

    out_view = pl.pallas_call(
        functools.partial(_log_trend_kernel, w_axis=w_axis, seg=seg),
        out_shape=jax.ShapeDtypeStruct((H, n_seg, seg), x.dtype),
        grid_spec=pltpu.PrefetchScalarGridSpec(
            num_scalar_prefetch=4,          # rows, gains, starts, lens -> SMEM
            grid=grid,
            in_specs=[x_spec],
            out_specs=x_spec,
        ),
        # Call arg 4 (x_view, after the 4 scalar-prefetch args) aliases output
        # 0: rows the grid never visits keep their HBM values, so traffic is
        # ~2*C*W elements instead of O(H*W).
        input_output_aliases={4: 0},
        compiler_params=pltpu.CompilerParams(
            dimension_semantics=("parallel", "parallel"),
            vmem_limit_bytes=vmem_limit),
    )(rows, gains, starts, lens, x_view)

    return out_view.reshape(H, W)


def build_augmentation_plan(key, h, w, gain=(-1.0, 1.0), length=None, channels=1):
    """Vectorized mirror of LogarithmicTrend.forward's random setup.

    Returns rows (C,), gains (C,), starts (C,), lens (C,).  Per the torch code,
    gain/length are indexed by the enumeration index, not by the sensor index.
    """
    length_ = w if not length else length
    channels_ = h if not channels else channels
    if not isinstance(channels_, int):
        # TODO(synk): tuple-valued `channels` draws a random row count (dynamic
        # shape); use the static upper bound instead.
        channels_ = int(channels_[1])

    k_gain, k_len, k_perm, k_start = jax.random.split(key, 4)

    if isinstance(gain, float):
        gain_vec = jnp.full((h,), gain, jnp.float32)
    else:
        gain_vec = (gain[0] - gain[1]) * jax.random.uniform(k_gain, (h,), jnp.float32) + gain[1]

    if isinstance(length_, int):
        len_vec = jnp.full((h,), length_, jnp.int32)
    else:
        len_vec = jax.random.randint(k_len, (h,), length_[0], length_[1], jnp.int32)

    rows = jax.random.permutation(k_perm, h)[:channels_].astype(jnp.int32)
    gains = gain_vec[:channels_]
    lens = len_vec[:channels_]
    starts = jax.random.randint(k_start, (channels_,), 0, w - lens + 1, jnp.int32)
    return rows, gains, starts, lens


def _check(out, ref, name):
    finite = jnp.isfinite(ref)
    tol = 1e-5 + 1e-5 * jnp.abs(ref)
    ok = bool(jnp.all(jnp.where(finite, jnp.abs(out - ref) <= tol, out == ref)))
    assert ok, f"Pallas output does not match reference ({name})"


if __name__ == "__main__":
    key = jax.random.PRNGKey(0)
    k1, k2, k3, k4, k5, k6 = jax.random.split(key, 6)

    fwd = jax.jit(logarithmic_trend,
                  static_argnames=("block_samples", "min_pallas_bytes"))

    # Case 1: several selected rows, bounded event length, single time block.
    H1, W1 = 8, 512
    x1 = jax.random.normal(k1, (H1, W1), jnp.float32)
    p1 = build_augmentation_plan(k2, H1, W1, gain=(-1.0, 1.0),
                                 length=(32, 200), channels=3)
    out1 = jax.block_until_ready(fwd(x1, *p1))
    _check(out1, _reference(x1, *p1), "case1")

    # Case 2: module defaults (channels=1, length=None -> full-row event incl.
    # the intentional -inf at the start); explicit block_samples forces a
    # multi-step grid with a partial edge block on the aliased output.
    H2, W2 = 16, 1408
    x2 = jax.random.normal(k3, (H2, W2), jnp.float32)
    p2 = build_augmentation_plan(k4, H2, W2, gain=(-1.0, 1.0),
                                 length=None, channels=1)
    out2 = jax.block_until_ready(fwd(x2, *p2, block_samples=512))
    _check(out2, _reference(x2, *p2), "case2")

    # Case 3: time width not a multiple of 128 -> whole-row (1, 1, W) blocks.
    H3, W3 = 6, 600
    x3 = jax.random.normal(k5, (H3, W3), jnp.float32)
    p3 = build_augmentation_plan(k6, H3, W3, gain=(-1.0, 1.0),
                                 length=(50, 300), channels=2)
    out3 = jax.block_until_ready(fwd(x3, *p3))
    _check(out3, _reference(x3, *p3), "case3")

    print("KERNEL_OK")
</pallas_src>

<mosaic_0001>
module attributes {stable_mosaic.version = 11 : i64} {
  func.func @_log_trend_kernel(%arg0: i32, %arg1: i32, %arg2: memref<3xi32, #tpu.memory_space<smem>>, %arg3: memref<3xf32, #tpu.memory_space<smem>>, %arg4: memref<3xi32, #tpu.memory_space<smem>>, %arg5: memref<3xi32, #tpu.memory_space<smem>>, %arg6: memref<1x4x128xf32, #tpu.memory_space<vmem>>, %arg7: memref<1x4x128xf32, #tpu.memory_space<vmem>>) attributes {dimension_semantics = [#tpu.dimension_semantics<parallel>, #tpu.dimension_semantics<parallel>], iteration_bounds = array<i64: 3, 1>, scalar_prefetch = 4 : i64, scratch_operands = 0 : i64, tpu.core_type = #tpu.core_type<tc>, window_params = [{transform_indices = @transform_0, window_bounds = array<i64: 1, 4, 128>}, {transform_indices = @transform_1, window_bounds = array<i64: 1, 4, 128>}]} {
    %0 = arith.index_cast %arg0 : i32 to index
    %1 = memref.load %arg3[%0] : memref<3xf32, #tpu.memory_space<smem>>
    %2 = arith.index_cast %arg0 : i32 to index
    %3 = memref.load %arg4[%2] : memref<3xi32, #tpu.memory_space<smem>>
    %4 = arith.index_cast %arg0 : i32 to index
    %5 = memref.load %arg5[%4] : memref<3xi32, #tpu.memory_space<smem>>
    %c512_i32 = arith.constant 512 : i32
    %6 = arith.muli %arg1, %c512_i32 : i32
    %7 = arith.subi %6, %3 : i32
    %8 = tpu.iota {dimensions = array<i32: 1>} : vector<1x4x128xi32>
    %9 = tpu.iota {dimensions = array<i32: 2>} : vector<1x4x128xi32>
    %c128_i32 = arith.constant 128 : i32
    %10 = vector.broadcast %c128_i32 : i32 to vector<1x4x128xi32>
    %11 = arith.muli %8, %10 : vector<1x4x128xi32>
    %12 = arith.addi %11, %9 : vector<1x4x128xi32>
    %13 = vector.broadcast %7 : i32 to vector<1x4x128xi32>
    %14 = arith.addi %12, %13 : vector<1x4x128xi32>
    %15 = vector.broadcast %5 : i32 to vector<1x4x128xi32>
    %16 = arith.cmpi ult, %14, %15 : vector<1x4x128xi32>
    %c1_i32 = arith.constant 1 : i32
    %17 = vector.broadcast %c1_i32 : i32 to vector<1x4x128xi32>
    %18 = arith.select %16, %14, %17 : vector<1x4x128xi1>, vector<1x4x128xi32>
    %19 = arith.sitofp %18 : vector<1x4x128xi32> to vector<1x4x128xf32>
    %20 = math.log %19 : vector<1x4x128xf32>
    %21 = vector.broadcast %1 : f32 to vector<1x4x128xf32>
    %22 = arith.mulf %21, %20 : vector<1x4x128xf32>
    %c0 = arith.constant 0 : index
    %c0_0 = arith.constant 0 : index
    %c0_1 = arith.constant 0 : index
    %23 = vector.load %arg6[%c0, %c0_0, %c0_1] : memref<1x4x128xf32, #tpu.memory_space<vmem>>, vector<1x4x128xf32>
    %24 = arith.addf %23, %22 : vector<1x4x128xf32>
    %c0_2 = arith.constant 0 : index
    %c0_3 = arith.constant 0 : index
    %c0_4 = arith.constant 0 : index
    %25 = vector.load %arg7[%c0_2, %c0_3, %c0_4] : memref<1x4x128xf32, #tpu.memory_space<vmem>>, vector<1x4x128xf32>
    tpu.vector_store %arg7[%c0_2, %c0_3, %c0_4], %24 {strides = array<i32>} : memref<1x4x128xf32, #tpu.memory_space<vmem>>, vector<1x4x128xf32>,
    return
  }
  func.func @transform_0(%arg0: i32, %arg1: i32, %arg2: memref<3xi32, #tpu.memory_space<smem>>, %arg3: memref<3xf32, #tpu.memory_space<smem>>, %arg4: memref<3xi32, #tpu.memory_space<smem>>, %arg5: memref<3xi32, #tpu.memory_space<smem>>) -> (i32, i32, i32) {
    %0 = arith.index_cast %arg0 : i32 to index
    %1 = memref.load %arg2[%0] : memref<3xi32, #tpu.memory_space<smem>>
    %c0_i32 = arith.constant 0 : i32
    %c0_i32_0 = arith.constant 0 : i32
    return %1, %arg1, %c0_i32 : i32, i32, i32
  }
  func.func @transform_1(%arg0: i32, %arg1: i32, %arg2: memref<3xi32, #tpu.memory_space<smem>>, %arg3: memref<3xf32, #tpu.memory_space<smem>>, %arg4: memref<3xi32, #tpu.memory_space<smem>>, %arg5: memref<3xi32, #tpu.memory_space<smem>>) -> (i32, i32, i32) {
    %0 = arith.index_cast %arg0 : i32 to index
    %1 = memref.load %arg2[%0] : memref<3xi32, #tpu.memory_space<smem>>
    %c0_i32 = arith.constant 0 : i32
    %c0_i32_0 = arith.constant 0 : i32
    return %1, %arg1, %c0_i32 : i32, i32, i32
  }
}

</mosaic_0001>

<bundles_post_ra>
// kernel: logarithmic_trend.1
= control target key start
LH: loop header
LB: loop body
LE: loop exit
PB: predicated region body
PF: predicated region fallthrough
CT: control target
= control target key end

     0   :  { %s471_s0 = inlined_call_operand.vmem [shape: s32[3], index: 0, kind: input, shape index: {}]   ;;  %s472_s4 = inlined_call_operand.vmem [shape: f32[8,4,128], index: 4, kind: input, shape index: {}, may-alias: {4,5}]   ;;  %s473_s5 = inlined_call_operand.vmem [shape: f32[8,4,128], index: 5, kind: output, shape index: {}, may-alias: {4,5}]   ;;  %s474_s1 = inlined_call_operand.vmem [shape: f32[3], index: 1, kind: input, shape index: {}]   ;;  %s475_s2 = inlined_call_operand.vmem [shape: s32[3], index: 2, kind: input, shape index: {}]   ;;  %s476_s3 = inlined_call_operand.vmem [shape: s32[3], index: 3, kind: input, shape index: {}]  }
   0x1   :  { %s10_s20 = sshll.u32 %s471_s0, 4  ;;  %s14_s23 = sshll.u32 %s474_s1, 4  ;;  %s11_s20 = int_to_ptr.vmem [resolvable:$true] %s10_s20  ;;  %s15_s23 = int_to_ptr.vmem [resolvable:$true] %s14_s23 }
   0x2   :  { %s318_s24 = scalar_lea.vmem %s11_s20, 16  ;;  %p323_p1 = scmp.lt.s32.totalorder %s11_s20, %s11_s20 }
   0x3   :  { %p319_p0 = scmp.ne.s32.totalorder %s11_s20, %s318_s24  ;;  %p324_p2 = scmp.lt.s32.totalorder %s318_s24, %s318_s24 }
   0x5   :  { %p325_p3 = por %p324_p2, %p323_p1 }
   0x7   :  { %p326_p4 = pnand %p325_p3, %p319_p0 }
   0x9   :  { %329 = shalt.err (!%p326_p4)  }
   0xa   :  { %s392_s25 = smov [#allocation3]   ;;  %s330_s26 = scalar_lea.vmem %s15_s23, 16 }
   0xb   :  { %13 = dma.vmem_to_smem %s11_s20, 16, %s392_s25, [#allocation2] }
   0xc   :  { %p331_p5 = scmp.ne.s32.totalorder %s15_s23, %s330_s26  ;;  %p335_p6 = scmp.lt.s32.totalorder %s15_s23, %s15_s23 }
   0xd   :  { %p336_p7 = scmp.lt.s32.totalorder %s330_s26, %s330_s26 }
   0xf   :  { %p337_p8 = por %p336_p7, %p335_p6 }
  0x11   :  { %p338_p9 = pnand %p337_p8, %p331_p5 }
  0x13   :  { %341 = shalt.err (!%p338_p9)  }
  0x14   :  { %s393_s0 = smov [#allocation4]   ;;  %s18_s28 = sshll.u32 %s475_s2, 4  ;;  %s19_s28 = int_to_ptr.vmem [resolvable:$true] %s18_s28 }
  0x15   :  { %17 = dma.vmem_to_smem %s15_s23, 16, %s393_s0, [#allocation2] }
  0x16   :  { %s22_s6 = sshll.u32 %s476_s3, 4  ;;  %s342_s7 = scalar_lea.vmem %s19_s28, 16  ;;  %s23_s6 = int_to_ptr.vmem [resolvable:$true] %s22_s6 }
  0x17   :  { %p343_p10 = scmp.ne.s32.totalorder %s19_s28, %s342_s7  ;;  %p347_p11 = scmp.lt.s32.totalorder %s19_s28, %s19_s28 }
  0x18   :  { %p348_p12 = scmp.lt.s32.totalorder %s342_s7, %s342_s7 }
  0x1a   :  { %p349_p13 = por %p348_p12, %p347_p11 }
  0x1c   :  { %p350_p0 = pnand %p349_p13, %p343_p10 }
  0x1e   :  { %353 = shalt.err (!%p350_p0)  }
  0x1f   :  { %s394_s8 = smov [#allocation5]   ;;  %s354_s9 = scalar_lea.vmem %s23_s6, 16 }
  0x20   :  { %21 = dma.vmem_to_smem %s19_s28, 16, %s394_s8, [#allocation2] }
  0x21   :  { %p355_p1 = scmp.ne.s32.totalorder %s23_s6, %s354_s9  ;;  %p359_p2 = scmp.lt.s32.totalorder %s23_s6, %s23_s6 }
  0x22   :  { %p360_p3 = scmp.lt.s32.totalorder %s354_s9, %s354_s9 }
  0x24   :  { %p361_p4 = por %p360_p3, %p359_p2 }
  0x26   :  { %p362_p5 = pnand %p361_p4, %p355_p1 }
  0x28   :  { %365 = shalt.err (!%p362_p5)  }
  0x29   :  { %s395_s2 = smov [#allocation6]  }
  0x2a   :  { %25 = dma.vmem_to_smem %s23_s6, 16, %s395_s2, [#allocation2] }
  0x2b   :  { %378 = dma.done.wait [#allocation2], 64 }
  0x2c   :  { %379 = vsyncadd [#allocation2], 4294967232 }
  0x2d   :  { %27 = sfence }
  0x2e   :  { %s438_s3 = smov 0   ;;  %s440_s10 = smov 0  }
  0x2f   :  { %s442_s11 = smov 0  }
  0x30 LB: > { %s45_s12 = sadd.s32 1, %s386_s10  ;;  %p283_p6 = scmp.ge.s32.totalorder %s390_s11, 1  ;;  %s390_s11 = sphi %s442_s11, %s33_s11   ;;  %s386_s10 = sphi %s440_s10, %s478_s10   ;;  %s382_s3 = sphi %s438_s3, %s477_s3  }
  0x31   : > { %p47_p7 = scmp.ge.s32.totalorder %s45_s12, 3  ;;  %p133_p8 = scmp.lt.s32.totalorder %s390_s11, 4 }
  0x33   : > { %s480_s12 = smov (%p47_p7, %s45_s12), 0  ;;  %p134_p9 = pnand %p283_p6, %p133_p8 }
  0x34   : > { %s178_s13 = sld [smem:[#allocation5 + %s382_s3]] (!%p134_p9) }
  0x35   : > { %137 = sbr.rel (%p134_p9) target bundleno = 93 (0x5d), region = 24  ;;  %s179_s14 = sld [smem:[#allocation6 + %s382_s3]] (!%p134_p9) }
  0x36   : > { %s159_s16 = sld [smem:[#allocation3 + %s382_s3]] (!%p134_p9) }
  0x37   : > { %s168_s17 = sld [smem:[#allocation3 + %s382_s3]] (!%p134_p9) }
  0x38   : > { %s177_s18 = sld [smem:[#allocation4 + %s382_s3]] (!%p134_p9) }
  0x3a   : > { %v182_v0 = vlaneseq  ;;  %s181_s15 = ssub.s32 0, %s178_s13 }
  0x3b   : > { %v188_v5 = vstv %s181_s15  ;;  %v190_v6 = vstv %s179_s14 }
  0x3c   : > { %v183_v1 = vshrl.u32 %v182_v0, 7  ;;  %v185_v2 = vand.u32 127, %v182_v0  ;;  %p160_p10 = scmp.lt.s32.totalorder %s159_s16, 7 }
  0x3d   : > { %p169_p11 = scmp.lt.s32.totalorder %s168_s17, 7 }
  0x3e   : > { %v186_v3 = vmul.u32 128, %v183_v1  ;;  %s482_s16 = smov (!%p160_p10, %s159_s16), 7  ;;  %v196_v11 = vstv %s177_s18 }
  0x3f   : > { %s284_s19 = sshll.u32 %s482_s16, 2  ;;  %s484_s17 = smov (!%p169_p11, %s168_s17), 7 }
  0x40   : > { %v187_v4 = vadd.s32 %v186_v3, %v185_v2  ;;  %s166_s22 = scalar_lea.vmem %s472_s4, %s284_s19  ;;  %s285_s23 = sshll.u32 %s484_s17, 2 }
  0x41   : > { %v198_v13 = vld [vmem:[%s166_s22] sm:$0xf]  ;;  %s175_s26 = scalar_lea.vmem %s473_s5, %s285_s23 }
  0x42   : > { %v189_v7 = vadd.s32 %v188_v5, %v187_v4 }
  0x44   : > { %vm191_vm0 = vcmp.lt.u32.totalorder %v189_v7, %v190_v6 }
  0x45   : > { %v192_v8 = vsel %vm191_vm0, %v189_v7, 1 }
  0x46   : > { %v193_v9 = vcvt.s32.f32 %v192_v8 }
  0x48   : > { %316 = vlog2.f32 %v193_v9 }
  0x55   : > { %v317_v10 = vpop.eup %316 }
  0x56   : > { %v195_v12 = vmul.f32 0.6931472, %v317_v10 }
  0x58   : > { %v197_v14 = vmul.f32 %v196_v11, %v195_v12 }
  0x5a   : > { %v199_v15 = vadd.f32 %v198_v13, %v197_v14 }
  0x5c   : > { %200 = vst [vmem:[%s175_s26] sm:$0xf] %v199_v15 }
  0x5d PF: > { %s33_s11 = sadd.s32 1, %s390_s11   ;;  %s477_s3 = smov %s386_s10 }
  0x5e   : > { %p30_p12 = scmp.ge.s32.totalorder %s33_s11, 5   ;;  %s478_s10 = smov %s480_s12 }
  0x60   :  { %32 = sbr.rel (!%p30_p12) target bundleno = 48 (0x30), region = 54 }

</bundles_post_ra>
